<compile_context>
chip_gen: v5e
topology: v5e:2x2
jax: 0.10.0
libtpu: 0.0.40
codegen_flags: <defaults>
</compile_context>

<pallas_src>
import jax
import jax.numpy as jnp
from jax.experimental import pallas as pl
from jax.experimental.pallas import tpu as pltpu

_SLOPE = 0.2  # nn.LeakyReLU(0.2) per the module spec.


def _leaky_relu(x, slope=_SLOPE):
    # max(x, slope*x) == LeakyReLU(slope) for 0 < slope < 1 (2 VALU ops).
    return jnp.maximum(x, slope * x)


def duonet_kernel(x_ref, w1_ref, b1_ref, w2_ref, b2_ref, w3_ref, b3_ref, o_ref):
    x = x_ref[...]                                                   # (TR, GR*C)

    # fc1 + LeakyReLU.   (Dropout(p=0.5) -> identity in eval mode.)
    h1 = jnp.dot(x, w1_ref[...], preferred_element_type=jnp.float32)
    h1 = _leaky_relu(h1 + b1_ref[...])                               # (TR, GR*first)

    # fc2 + LeakyReLU.
    h2 = jnp.dot(h1, w2_ref[...], preferred_element_type=jnp.float32)
    h2 = _leaky_relu(h2 + b2_ref[...])                               # (TR, GR*second)

    # fc3 + Sigmoid (EUP exp / reciprocal).
    h3 = jnp.dot(h2, w3_ref[...], preferred_element_type=jnp.float32)
    o_ref[...] = jax.nn.sigmoid(h3 + b3_ref[...]).astype(o_ref.dtype)  # (TR, GR)


def _round_up(a, m):
    return (a + m - 1) // m * m


def duonet_forward(x, params, vmem_budget_bytes=10 * 1024 * 1024):
    """x: (B, in_channels) float32.  Returns (B, 1) float32."""
    w1, b1 = params["w1"], params["b1"]
    w2, b2 = params["w2"], params["b2"]
    w3, b3 = params["w3"], params["b3"]

    B, C = x.shape
    first, second = w1.shape[0], w2.shape[0]

    # Lane-packing factor: GR consecutive batch rows share one 128-lane row.
    GR = 128 // C if (C <= 128 and 128 % C == 0 and B % (128 // C) == 0) else 1
    Cp = GR * C
    R = B // GR
    xp = x.reshape(R, Cp)                  # contiguous reshape: free, no HBM pass

    # Tiny weights, packed once (block-diagonal) to match the lane packing.
    w1t = w1.T.astype(jnp.float32)         # (C, first)
    w2t = w2.T.astype(jnp.float32)         # (first, second)
    w3t = w3.T.astype(jnp.float32)         # (second, 1)
    if GR == 1:
        W1p, W2p, W3p = w1t, w2t, w3t
        B1p = b1.reshape(1, first)
        B2p = b2.reshape(1, second)
        B3p = b3.reshape(1, 1)
    else:
        eye = jnp.eye(GR, dtype=jnp.float32)
        W1p = jnp.kron(eye, w1t)                          # (GR*C,      GR*first)
        W2p = jnp.kron(eye, w2t)                          # (GR*first,  GR*second)
        W3p = jnp.kron(eye, w3t)                          # (GR*second, GR)
        B1p = jnp.tile(b1, GR).reshape(1, GR * first)
        B2p = jnp.tile(b2, GR).reshape(1, GR * second)
        B3p = jnp.tile(b3, GR).reshape(1, GR)

    # Rows per grid step from a conservative VMEM budget: double-buffered x
    # tile + h1/h2 temporaries (2x slack) + double-buffered output, all
    # lane-padded to 128.
    lane = lambda n: _round_up(n, 128)
    bytes_per_row = 4 * (2 * lane(Cp) + 2 * lane(GR * first)
                         + 2 * lane(GR * second) + 2 * lane(GR))
    rows_budget = max(8, (vmem_budget_bytes // bytes_per_row) // 8 * 8)

    if R <= 8:
        TR = R                                            # single tiny block
    else:
        TR = min(rows_budget, _round_up(R, 8))
        # Keep >= 2 grid steps so ("parallel",) can feed both v7x TensorCores.
        if R >= 16 and pl.cdiv(R, TR) < 2:
            TR = max(8, _round_up(pl.cdiv(R, 2), 8))
    grid = (pl.cdiv(R, TR),)

    def resident(a):
        return pl.BlockSpec(a.shape, lambda i: (0, 0))    # constant index_map

    cost = pl.CostEstimate(
        flops=2 * B * (C * first + first * second + second),
        transcendentals=B,
        bytes_accessed=B * C * 4 + B * 4
        + 4 * (w1.size + w2.size + w3.size + b1.size + b2.size + b3.size),
    )

    out = pl.pallas_call(
        duonet_kernel,
        out_shape=jax.ShapeDtypeStruct((R, GR), jnp.float32),
        grid=grid,
        in_specs=[
            pl.BlockSpec((TR, Cp), lambda i: (i, 0)),     # lane-dense x tile
            resident(W1p), resident(B1p),
            resident(W2p), resident(B2p),
            resident(W3p), resident(B3p),
        ],
        out_specs=pl.BlockSpec((TR, GR), lambda i: (i, 0)),
        compiler_params=pltpu.CompilerParams(
            dimension_semantics=("parallel",),            # shard batch on v7x
            vmem_limit_bytes=32 * 1024 * 1024,            # v5e default is 16 MiB
        ),
        cost_estimate=cost,
    )(xp, W1p, B1p, W2p, B2p, W3p, B3p)

    return out.reshape(B, 1)                              # contiguous: free


def init_params(key, in_channels, first, second):
    """Deterministic init mimicking nn.Linear shapes (out, in) + (out,)."""
    ks = jax.random.split(key, 6)

    def lin(kw, kb, fan_in, fan_out):
        bound = 1.0 / jnp.sqrt(fan_in)
        w = jax.random.uniform(kw, (fan_out, fan_in), jnp.float32, -bound, bound)
        b = jax.random.uniform(kb, (fan_out,), jnp.float32, -bound, bound)
        return w, b

    w1, b1 = lin(ks[0], ks[1], in_channels, first)
    w2, b2 = lin(ks[2], ks[3], first, second)
    w3, b3 = lin(ks[4], ks[5], second, 1)
    return {"w1": w1, "b1": b1, "w2": w2, "b2": b2, "w3": w3, "b3": b3}


if __name__ == "__main__":
    in_channels, first, second = 16, 32, 16
    batch = 8

    key = jax.random.PRNGKey(0)
    kx, kp = jax.random.split(key)
    x = jax.random.normal(kx, (batch, in_channels), jnp.float32)
    params = init_params(kp, in_channels, first, second)

    out = jax.block_until_ready(duonet_forward(x, params))

    # Pure-JAX reference (eval-mode dropout = identity).
    def ref(x, p):
        h = x @ p["w1"].T + p["b1"]
        h = jnp.where(h > 0, h, _SLOPE * h)
        h = h @ p["w2"].T + p["b2"]
        h = jnp.where(h > 0, h, _SLOPE * h)
        h = h @ p["w3"].T + p["b3"]
        return jax.nn.sigmoid(h)

    expected = ref(x, params)
    assert out.shape == (batch, 1), out.shape
    err = float(jnp.max(jnp.abs(out - expected)))
    assert jnp.allclose(out, expected, atol=1e-5, rtol=1e-5), err
    print("KERNEL_OK")
</pallas_src>

<mosaic_0001>
module attributes {stable_mosaic.version = 11 : i64} {
  func.func @duonet_kernel(%arg0: i32, %arg1: memref<1x128xf32, #tpu.memory_space<vmem>>, %arg2: memref<128x256xf32, #tpu.memory_space<vmem>>, %arg3: memref<1x256xf32, #tpu.memory_space<vmem>>, %arg4: memref<256x128xf32, #tpu.memory_space<vmem>>, %arg5: memref<1x128xf32, #tpu.memory_space<vmem>>, %arg6: memref<128x8xf32, #tpu.memory_space<vmem>>, %arg7: memref<1x8xf32, #tpu.memory_space<vmem>>, %arg8: memref<1x8xf32, #tpu.memory_space<vmem>>) attributes {dimension_semantics = [#tpu.dimension_semantics<parallel>], iteration_bounds = array<i64: 1>, scalar_prefetch = 0 : i64, scratch_operands = 0 : i64, tpu.core_type = #tpu.core_type<tc>, window_params = [{transform_indices = @transform_0, window_bounds = array<i64: 1, 128>}, {pipeline_mode = #tpu.pipeline_mode<synchronous>, transform_indices = @transform_1, window_bounds = array<i64: 128, 256>}, {pipeline_mode = #tpu.pipeline_mode<synchronous>, transform_indices = @transform_2, window_bounds = array<i64: 1, 256>}, {pipeline_mode = #tpu.pipeline_mode<synchronous>, transform_indices = @transform_3, window_bounds = array<i64: 256, 128>}, {pipeline_mode = #tpu.pipeline_mode<synchronous>, transform_indices = @transform_4, window_bounds = array<i64: 1, 128>}, {pipeline_mode = #tpu.pipeline_mode<synchronous>, transform_indices = @transform_5, window_bounds = array<i64: 128, 8>}, {pipeline_mode = #tpu.pipeline_mode<synchronous>, transform_indices = @transform_6, window_bounds = array<i64: 1, 8>}, {transform_indices = @transform_7, window_bounds = array<i64: 1, 8>}]} {
    %c0 = arith.constant 0 : index
    %c0_0 = arith.constant 0 : index
    %0 = vector.load %arg1[%c0, %c0_0] : memref<1x128xf32, #tpu.memory_space<vmem>>, vector<1x128xf32>
    %c0_1 = arith.constant 0 : index
    %c0_2 = arith.constant 0 : index
    %1 = vector.load %arg2[%c0_1, %c0_2] : memref<128x256xf32, #tpu.memory_space<vmem>>, vector<128x256xf32>
    %cst = arith.constant dense<0.000000e+00> : vector<1x256xf32>
    %2 = tpu.matmul %0, %1, %cst {dimension_numbers = #tpu.dot_dimension_numbers<[1], [0], [0], [1], [0, 0, 1, 1], [], []>} : vector<1x128xf32>, vector<128x256xf32>, vector<1x256xf32> -> vector<1x256xf32>
    %c0_3 = arith.constant 0 : index
    %c0_4 = arith.constant 0 : index
    %3 = vector.load %arg3[%c0_3, %c0_4] : memref<1x256xf32, #tpu.memory_space<vmem>>, vector<1x256xf32>
    %4 = arith.addf %2, %3 : vector<1x256xf32>
    %cst_5 = arith.constant 2.000000e-01 : f32
    %5 = vector.broadcast %cst_5 : f32 to vector<1x256xf32>
    %6 = arith.mulf %5, %4 : vector<1x256xf32>
    %7 = arith.maximumf %4, %6 : vector<1x256xf32>
    %c0_6 = arith.constant 0 : index
    %c0_7 = arith.constant 0 : index
    %8 = vector.load %arg4[%c0_6, %c0_7] : memref<256x128xf32, #tpu.memory_space<vmem>>, vector<256x128xf32>
    %cst_8 = arith.constant dense<0.000000e+00> : vector<1x128xf32>
    %9 = tpu.matmul %7, %8, %cst_8 {dimension_numbers = #tpu.dot_dimension_numbers<[1], [0], [0], [1], [0, 0, 1, 1], [], []>} : vector<1x256xf32>, vector<256x128xf32>, vector<1x128xf32> -> vector<1x128xf32>
    %c0_9 = arith.constant 0 : index
    %c0_10 = arith.constant 0 : index
    %10 = vector.load %arg5[%c0_9, %c0_10] : memref<1x128xf32, #tpu.memory_space<vmem>>, vector<1x128xf32>
    %11 = arith.addf %9, %10 : vector<1x128xf32>
    %cst_11 = arith.constant 2.000000e-01 : f32
    %12 = vector.broadcast %cst_11 : f32 to vector<1x128xf32>
    %13 = arith.mulf %12, %11 : vector<1x128xf32>
    %14 = arith.maximumf %11, %13 : vector<1x128xf32>
    %c0_12 = arith.constant 0 : index
    %c0_13 = arith.constant 0 : index
    %15 = vector.load %arg6[%c0_12, %c0_13] : memref<128x8xf32, #tpu.memory_space<vmem>>, vector<128x8xf32>
    %cst_14 = arith.constant dense<0.000000e+00> : vector<1x8xf32>
    %16 = tpu.matmul %14, %15, %cst_14 {dimension_numbers = #tpu.dot_dimension_numbers<[1], [0], [0], [1], [0, 0, 1, 1], [], []>} : vector<1x128xf32>, vector<128x8xf32>, vector<1x8xf32> -> vector<1x8xf32>
    %c0_15 = arith.constant 0 : index
    %c0_16 = arith.constant 0 : index
    %17 = vector.load %arg7[%c0_15, %c0_16] : memref<1x8xf32, #tpu.memory_space<vmem>>, vector<1x8xf32>
    %18 = arith.addf %16, %17 : vector<1x8xf32>
    %19 = arith.negf %18 : vector<1x8xf32>
    %20 = math.exp %19 : vector<1x8xf32>
    %cst_17 = arith.constant 1.000000e+00 : f32
    %21 = vector.broadcast %cst_17 : f32 to vector<1x8xf32>
    %22 = arith.addf %21, %20 : vector<1x8xf32>
    %23 = arith.divf %21, %22 : vector<1x8xf32>
    %c0_18 = arith.constant 0 : index
    %c0_19 = arith.constant 0 : index
    %24 = vector.load %arg8[%c0_18, %c0_19] : memref<1x8xf32, #tpu.memory_space<vmem>>, vector<1x8xf32>
    tpu.vector_store %arg8[%c0_18, %c0_19], %23 {strides = array<i32>} : memref<1x8xf32, #tpu.memory_space<vmem>>, vector<1x8xf32>,
    return
  }
  func.func @transform_0(%arg0: i32) -> (i32, i32) {
    %c0_i32 = arith.constant 0 : i32
    %c0_i32_0 = arith.constant 0 : i32
    return %arg0, %c0_i32 : i32, i32
  }
  func.func @transform_1(%arg0: i32) -> (i32, i32) {
    %c0_i32 = arith.constant 0 : i32
    %c0_i32_0 = arith.constant 0 : i32
    %c0_i32_1 = arith.constant 0 : i32
    return %c0_i32, %c0_i32_0 : i32, i32
  }
  func.func @transform_2(%arg0: i32) -> (i32, i32) {
    %c0_i32 = arith.constant 0 : i32
    %c0_i32_0 = arith.constant 0 : i32
    %c0_i32_1 = arith.constant 0 : i32
    return %c0_i32, %c0_i32_0 : i32, i32
  }
  func.func @transform_3(%arg0: i32) -> (i32, i32) {
    %c0_i32 = arith.constant 0 : i32
    %c0_i32_0 = arith.constant 0 : i32
    %c0_i32_1 = arith.constant 0 : i32
    return %c0_i32, %c0_i32_0 : i32, i32
  }
  func.func @transform_4(%arg0: i32) -> (i32, i32) {
    %c0_i32 = arith.constant 0 : i32
    %c0_i32_0 = arith.constant 0 : i32
    %c0_i32_1 = arith.constant 0 : i32
    return %c0_i32, %c0_i32_0 : i32, i32
  }
  func.func @transform_5(%arg0: i32) -> (i32, i32) {
    %c0_i32 = arith.constant 0 : i32
    %c0_i32_0 = arith.constant 0 : i32
    %c0_i32_1 = arith.constant 0 : i32
    return %c0_i32, %c0_i32_0 : i32, i32
  }
  func.func @transform_6(%arg0: i32) -> (i32, i32) {
    %c0_i32 = arith.constant 0 : i32
    %c0_i32_0 = arith.constant 0 : i32
    %c0_i32_1 = arith.constant 0 : i32
    return %c0_i32, %c0_i32_0 : i32, i32
  }
  func.func @transform_7(%arg0: i32) -> (i32, i32) {
    %c0_i32 = arith.constant 0 : i32
    %c0_i32_0 = arith.constant 0 : i32
    return %arg0, %c0_i32 : i32, i32
  }
}

</mosaic_0001>

<bundles_post_ra>
// kernel: tpu_custom_call.1
= control target key start
LH: loop header
LB: loop body
LE: loop exit
PB: predicated region body
PF: predicated region fallthrough
CT: control target
= control target key end

     0   :  { %12 = vsyncpa [#allocation3], 0  ;;  %s499_s0 = inlined_call_operand.vmem [shape: f32[1,128], index: 0, kind: input, shape index: {}]   ;;  %s500_s1 = inlined_call_operand.hbm [shape: f32[128,256], index: 1, kind: input, shape index: {}]   ;;  %s501_s2 = inlined_call_operand.vmem [shape: f32[1,256], index: 2, kind: input, shape index: {}]   ;;  %s502_s3 = inlined_call_operand.hbm [shape: f32[256,128], index: 3, kind: input, shape index: {}]   ;;  %s503_s4 = inlined_call_operand.vmem [shape: f32[1,128], index: 4, kind: input, shape index: {}]   ;;  %s504_s5 = inlined_call_operand.vmem [shape: f32[128,8], index: 5, kind: input, shape index: {}]   ;;  %s505_s6 = inlined_call_operand.vmem [shape: f32[1,8], index: 6, kind: input, shape index: {}]   ;;  %s506_s7 = inlined_call_operand.hbm [shape: f32[1,8], index: 7, kind: output, shape index: {}]  }
   0x1   :  { %13 = vsyncpa [#allocation6], 0 }
   0x2   :  { %14 = vsyncpa [#allocation4], 0  ;;  %s21_s26 = sshll.u32 %s500_s1, 4  ;;  %s383_s27 = smov [#allocation2]   ;;  %s22_s26 = int_to_ptr.hbm [resolvable:$true] %s21_s26 }
   0x3   :  { %s23_s28 = sshll.u32 %s383_s27, 4  ;;  %s36_s8 = sshll.u32 %s502_s3, 4  ;;  %s24_s28 = int_to_ptr.vmem [resolvable:$true] %s23_s28  ;;  %s37_s8 = int_to_ptr.hbm [resolvable:$true] %s36_s8 }
   0x4   :  { %s384_s9 = smov 256   ;;  %s385_s10 = smov 16  }
   0x5   :  { %29 = dma.hbm_to_vmem [thread:$0]  %s22_s26, 4096, %s24_s28, [#allocation3], %s384_s9, %s384_s9, %s385_s10  }
   0x6   :  { %s386_s11 = smov [#allocation5]   ;;  %s387_s13 = smov 128  }
   0x7   :  { %s38_s12 = sshll.u32 %s386_s11, 4  ;;  %s388_s14 = smov 8   ;;  %s39_s12 = int_to_ptr.vmem [resolvable:$true] %s38_s12 }
   0x8   :  { %44 = dma.hbm_to_vmem [thread:$0]  %s37_s8, 4096, %s39_s12, [#allocation6], %s387_s13, %s387_s13, %s388_s14  }
   0x9   :  { %377 = dma.done.wait [#allocation3], 4096  }
   0xa   :  { %378 = vsyncadd [#allocation3], 4294963200 }
   0xb   :  { %379 = dma.done.wait [#allocation6], 4096  }
   0xc   :  { %380 = vsyncadd [#allocation6], 4294963200  ;;  %v90_v0 = vld [vmem:[#allocation2 + $0xf0] sm:$0xff]  ;;  %v91_v1 = vld [vmem:[#allocation2 + $0xf8] sm:$0xff]  ;;  %vm273_vm3 = vcmask 57344  }
   0xd   :  { %v88_v2 = vld [vmem:[#allocation2 + $0xe0] sm:$0xff]  ;;  %98 = vmatpush.msra.mxu0 %v90_v0  ;;  %118 = vmatpush.msra.mxu1 %v91_v1  ;;  %v89_v3 = vld [vmem:[#allocation2 + $0xe8] sm:$0xff]  ;;  %v86_v4 = vld [vmem:[#allocation2 + $0xd0] sm:$0xff] }
   0xe   :  { %v87_v5 = vld [vmem:[#allocation2 + $0xd8] sm:$0xff]  ;;  %v84_v6 = vld [vmem:[#allocation2 + $0xc0] sm:$0xff]  ;;  %v85_v7 = vld [vmem:[#allocation2 + $0xc8] sm:$0xff] }
   0xf   :  { %99 = vmatpush.msra.mxu0 %v88_v2  ;;  %119 = vmatpush.msra.mxu1 %v89_v3  ;;  %v82_v8 = vld [vmem:[#allocation2 + $0xb0] sm:$0xff]  ;;  %v83_v9 = vld [vmem:[#allocation2 + $0xb8] sm:$0xff]  ;;  %v80_v10 = vld [vmem:[#allocation2 + $0xa0] sm:$0xff] }
  0x10   :  { %v81_v11 = vld [vmem:[#allocation2 + $0xa8] sm:$0xff]  ;;  %v78_v12 = vld [vmem:[#allocation2 + $0x90] sm:$0xff]  ;;  %v79_v13 = vld [vmem:[#allocation2 + $0x98] sm:$0xff] }
  0x11   :  { %100 = vmatpush.msra.mxu0 %v86_v4  ;;  %120 = vmatpush.msra.mxu1 %v87_v5  ;;  %v157_v14 = vld [vmem:[#allocation5 + $0x78] sm:$0xff]  ;;  %v156_v16 = vld [vmem:[#allocation5 + $0x70] sm:$0xff]  ;;  %v76_v17 = vld [vmem:[#allocation2 + $0x80] sm:$0xff] }
  0x12   :  { %v173_v15 = vld [vmem:[#allocation5 + $0xf8] sm:$0xff]  ;;  %v77_v18 = vld [vmem:[#allocation2 + $0x88] sm:$0xff]  ;;  %175 = vmatpush.msra.mxu2 %v157_v14  ;;  %v172_v19 = vld [vmem:[#allocation5 + $0xf0] sm:$0xff] }
  0x13   :  { %101 = vmatpush.msra.mxu0 %v84_v6  ;;  %121 = vmatpush.msra.mxu1 %v85_v7  ;;  %v155_v20 = vld [vmem:[#allocation5 + $0x68] sm:$0xff]  ;;  %v74_v22 = vld [vmem:[#allocation2 + $0x70] sm:$0xff]  ;;  %v75_v23 = vld [vmem:[#allocation2 + $0x78] sm:$0xff] }
  0x14   :  { %195 = vmatpush.msra.mxu3 %v173_v15  ;;  %v171_v21 = vld [vmem:[#allocation5 + $0xe8] sm:$0xff]  ;;  %176 = vmatpush.msra.mxu2 %v156_v16  ;;  %v154_v24 = vld [vmem:[#allocation5 + $0x60] sm:$0xff]  ;;  %v153_v28 = vld [vmem:[#allocation5 + $0x58] sm:$0xff] }
  0x15   :  { %102 = vmatpush.msra.mxu0 %v82_v8  ;;  %122 = vmatpush.msra.mxu1 %v83_v9  ;;  %v170_v25 = vld [vmem:[#allocation5 + $0xe0] sm:$0xff]  ;;  %v73_v27 = vld [vmem:[#allocation2 + $0x68] sm:$0xff]  ;;  %v169_v29 = vld [vmem:[#allocation5 + $0xd8] sm:$0xff] }
  0x16   :  { %196 = vmatpush.msra.mxu3 %v172_v19  ;;  %v72_v26 = vld [vmem:[#allocation2 + $0x60] sm:$0xff]  ;;  %177 = vmatpush.msra.mxu2 %v155_v20  ;;  %v70_v30 = vld [vmem:[#allocation2 + $0x50] sm:$0xff]  ;;  %v71_v31 = vld [vmem:[#allocation2 + $0x58] sm:$0xff] }
  0x17   :  { %103 = vmatpush.msra.mxu0 %v80_v10  ;;  %123 = vmatpush.msra.mxu1 %v81_v11  ;;  %v152_v32 = vld [vmem:[#allocation5 + $0x50] sm:$0xff]  ;;  %v68_v34 = vld [vmem:[#allocation2 + $0x40] sm:$0xff]  ;;  %v69_v35 = vld [vmem:[#allocation2 + $0x48] sm:$0xff] }
  0x18   :  { %197 = vmatpush.msra.mxu3 %v171_v21  ;;  %178 = vmatpush.msra.mxu2 %v154_v24  ;;  %v168_v33 = vld [vmem:[#allocation5 + $0xd0] sm:$0xff]  ;;  %v151_v36 = vld [vmem:[#allocation5 + $0x48] sm:$0xff]  ;;  %v67_v39 = vld [vmem:[#allocation2 + $0x38] sm:$0xff] }
  0x19   :  { %104 = vmatpush.msra.mxu0 %v78_v12  ;;  %124 = vmatpush.msra.mxu1 %v79_v13  ;;  %v167_v37 = vld [vmem:[#allocation5 + $0xc8] sm:$0xff]  ;;  %v66_v38 = vld [vmem:[#allocation2 + $0x30] sm:$0xff]  ;;  %v150_v40 = vld [vmem:[#allocation5 + $0x40] sm:$0xff] }
  0x1a   :  { %198 = vmatpush.msra.mxu3 %v170_v25  ;;  %179 = vmatpush.msra.mxu2 %v153_v28  ;;  %v166_v41 = vld [vmem:[#allocation5 + $0xc0] sm:$0xff]  ;;  %v65_v43 = vld [vmem:[#allocation2 + $0x28] sm:$0xff]  ;;  %v149_v44 = vld [vmem:[#allocation5 + $0x38] sm:$0xff] }
  0x1b   :  { %105 = vmatpush.msra.mxu0 %v76_v17  ;;  %125 = vmatpush.msra.mxu1 %v77_v18  ;;  %v64_v42 = vld [vmem:[#allocation2 + $0x20] sm:$0xff]  ;;  %v165_v45 = vld [vmem:[#allocation5 + $0xb8] sm:$0xff]  ;;  %v62_v46 = vld [vmem:[#allocation2 + $0x10] sm:$0xff] }
  0x1c   :  { %199 = vmatpush.msra.mxu3 %v169_v29  ;;  %180 = vmatpush.msra.mxu2 %v152_v32  ;;  %v63_v47 = vld [vmem:[#allocation2 + $0x18] sm:$0xff]  ;;  %v148_v48 = vld [vmem:[#allocation5 + $0x30] sm:$0xff]  ;;  %v60_v50 = vld [vmem:[#allocation2] sm:$0xff] }
  0x1d   :  { %106 = vmatpush.msra.mxu0 %v74_v22  ;;  %126 = vmatpush.msra.mxu1 %v75_v23  ;;  %v164_v49 = vld [vmem:[#allocation5 + $0xb0] sm:$0xff]  ;;  %v61_v51 = vld [vmem:[#allocation2 + $0x8] sm:$0xff]  ;;  %v59_v52 = vld [vmem:[%s499_s0] sm:$0x1] }
  0x1e   :  { %200 = vmatpush.msra.mxu3 %v168_v33  ;;  %181 = vmatpush.msra.mxu2 %v151_v36  ;;  %v147_v53 = vld [vmem:[#allocation5 + $0x28] sm:$0xff]  ;;  %v146_v55 = vld [vmem:[#allocation5 + $0x20] sm:$0xff]  ;;  %v145_v57 = vld [vmem:[#allocation5 + $0x18] sm:$0xff] }
  0x1f   :  { %107 = vmatpush.msra.mxu0 %v72_v26  ;;  %127 = vmatpush.msra.mxu1 %v73_v27  ;;  %v163_v54 = vld [vmem:[#allocation5 + $0xa8] sm:$0xff]  ;;  %v162_v56 = vld [vmem:[#allocation5 + $0xa0] sm:$0xff]  ;;  %v161_v58 = vld [vmem:[#allocation5 + $0x98] sm:$0xff] }
  0x20   :  { %201 = vmatpush.msra.mxu3 %v167_v37  ;;  %182 = vmatpush.msra.mxu2 %v150_v40  ;;  %v144_v59 = vld [vmem:[#allocation5 + $0x10] sm:$0xff]  ;;  %v143_v61 = vld [vmem:[#allocation5 + $0x8] sm:$0xff]  ;;  %v142_v63 = vld [vmem:[#allocation5] sm:$0xff] }
  0x21   :  { %108 = vmatpush.msra.mxu0 %v70_v30  ;;  %128 = vmatpush.msra.mxu1 %v71_v31  ;;  %v160_v60 = vld [vmem:[#allocation5 + $0x90] sm:$0xff]  ;;  %v159_v62 = vld [vmem:[#allocation5 + $0x88] sm:$0xff]  ;;  %v158_v0 = vld [vmem:[#allocation5 + $0x80] sm:$0xff] }
  0x22   :  { %202 = vmatpush.msra.mxu3 %v166_v41  ;;  %183 = vmatpush.msra.mxu2 %v149_v44  ;;  %v232_v1 = vld [vmem:[%s504_s5 + $0x78] sm:$0xff]  ;;  %v231_v2 = vld [vmem:[%s504_s5 + $0x70] sm:$0xff]  ;;  %v230_v3 = vld [vmem:[%s504_s5 + $0x68] sm:$0xff] }
  0x23   :  { %109 = vmatpush.msra.mxu0 %v68_v34  ;;  %129 = vmatpush.msra.mxu1 %v69_v35  ;;  %v229_v4 = vld [vmem:[%s504_s5 + $0x60] sm:$0xff]  ;;  %v228_v5 = vld [vmem:[%s504_s5 + $0x58] sm:$0xff]  ;;  %v227_v6 = vld [vmem:[%s504_s5 + $0x50] sm:$0xff] }
  0x24   :  { %203 = vmatpush.msra.mxu3 %v165_v45  ;;  %184 = vmatpush.msra.mxu2 %v148_v48  ;;  %v226_v7 = vld [vmem:[%s504_s5 + $0x48] sm:$0xff]  ;;  %v225_v8 = vld [vmem:[%s504_s5 + $0x40] sm:$0xff]  ;;  %v224_v9 = vld [vmem:[%s504_s5 + $0x38] sm:$0xff] }
  0x25   :  { %110 = vmatpush.msra.mxu0 %v66_v38  ;;  %130 = vmatpush.msra.mxu1 %v67_v39  ;;  %v223_v10 = vld [vmem:[%s504_s5 + $0x30] sm:$0xff]  ;;  %v222_v11 = vld [vmem:[%s504_s5 + $0x28] sm:$0xff]  ;;  %v92_v12 = vld [vmem:[%s501_s2] sm:$0x3] }
  0x26   :  { %204 = vmatpush.msra.mxu3 %v164_v49  ;;  %185 = vmatpush.msra.mxu2 %v147_v53  ;;  %v94_v13 = vperm.slane %v92_v12, 0  ;;  %v95_v14 = vperm.slane %v92_v12, 1  ;;  %v221_v23 = vld [vmem:[%s504_s5 + $0x20] sm:$0xff]  ;;  %v220_v24 = vld [vmem:[%s504_s5 + $0x18] sm:$0xff]  ;;  %v219_v25 = vld [vmem:[%s504_s5 + $0x10] sm:$0xff] }
  0x27   :  { %111 = vmatpush.msra.mxu0 %v64_v42  ;;  %131 = vmatpush.msra.mxu1 %v65_v43  ;;  %v218_v26 = vld [vmem:[%s504_s5 + $0x8] sm:$0xff]  ;;  %v217_v27 = vld [vmem:[%s504_s5] sm:$0xff] }
  0x28   :  { %205 = vmatpush.msra.mxu3 %v163_v54  ;;  %186 = vmatpush.msra.mxu2 %v146_v55  ;;  %v174_v28 = vld [vmem:[%s503_s4] sm:$0x1]  ;;  %s389_s4 = smov [#allocation7]  }
  0x29   :  { %112 = vmatpush.msra.mxu0 %v62_v46  ;;  %132 = vmatpush.msra.mxu1 %v63_v47  ;;  %v233_v35 = vld [vmem:[%s505_s6] sm:$0x1]  ;;  %s280_s5 = sshll.u32 %s389_s4, 4  ;;  %s282_s6 = sshll.u32 %s506_s7, 4  ;;  %s281_s5 = int_to_ptr.vmem [resolvable:$true] %s280_s5  ;;  %s283_s6 = int_to_ptr.hbm [resolvable:$true] %s282_s6 }
  0x2a   :  { %206 = vmatpush.msra.mxu3 %v162_v56  ;;  %187 = vmatpush.msra.mxu2 %v145_v57 }
  0x2b   :  { %113 = vmatpush.msra.mxu0 %v60_v50  ;;  %133 = vmatpush.msra.mxu1 %v61_v51 }
  0x2c   :  { %114 = vmatmul.f32.vlgmr.msra.gmra.mxu0 %v59_v52  ;;  %134 = vmatmul.f32.vlgmr.msra.gmra.mxu1 %v59_v52 }
  0x2d   :  { %207 = vmatpush.msra.mxu3 %v161_v58  ;;  %188 = vmatpush.msra.mxu2 %v144_v59 }
  0x2e   :  { %234 = vmatpush.msrb.mxu0 %v232_v1 }
  0x2f   :  { %208 = vmatpush.msra.mxu3 %v160_v60  ;;  %189 = vmatpush.msra.mxu2 %v143_v61 }
  0x30   :  { %235 = vmatpush.msrb.mxu0 %v231_v2 }
  0x31   :  { %209 = vmatpush.msra.mxu3 %v159_v62  ;;  %190 = vmatpush.msra.mxu2 %v142_v63 }
  0x32   :  { %236 = vmatpush.msrb.mxu0 %v230_v3 }
  0x33   :  { %210 = vmatpush.msra.mxu3 %v158_v0 }
  0x34   :  { %237 = vmatpush.msrb.mxu0 %v229_v4 }
  0x36   :  { %238 = vmatpush.msrb.mxu0 %v228_v5 }
  0x38   :  { %239 = vmatpush.msrb.mxu0 %v227_v6 }
  0x3a   :  { %240 = vmatpush.msrb.mxu0 %v226_v7 }
  0x3c   :  { %241 = vmatpush.msrb.mxu0 %v225_v8 }
  0x3e   :  { %242 = vmatpush.msrb.mxu0 %v224_v9 }
  0x40   :  { %243 = vmatpush.msrb.mxu0 %v223_v10 }
  0x42   :  { %244 = vmatpush.msrb.mxu0 %v222_v11 }
  0x44   :  { %245 = vmatpush.msrb.mxu0 %v221_v23 }
  0x46   :  { %246 = vmatpush.msrb.mxu0 %v220_v24 }
  0x48   :  { %247 = vmatpush.msrb.mxu0 %v219_v25 }
  0x4a   :  { %248 = vmatpush.msrb.mxu0 %v218_v26 }
  0x4c   :  { %249 = vmatpush.msrb.mxu0 %v217_v27 }
  0xa9   :  { %v115_v15 = vpop.f32.mrf.mxu0  ;;  %v135_v16 = vpop.f32.mrf.mxu1 }
  0xaa   :  { %v116_v17 = vadd.f32 %v115_v15, %v94_v13  ;;  %v136_v18 = vadd.f32 %v135_v16, %v95_v14 }
  0xac   :  { %v138_v19 = vmul.f32 0.2, %v116_v17  ;;  %v139_v20 = vmul.f32 0.2, %v136_v18 }
  0xae   :  { %v140_v21 = vmax.f32 %v116_v17, %v138_v19  ;;  %v141_v22 = vmax.f32 %v136_v18, %v139_v20 }
  0xb0   :  { %191 = vmatmul.f32.vlgmr.msra.gmra.mxu2 %v140_v21  ;;  %211 = vmatmul.f32.vlgmr.msra.gmra.mxu3 %v141_v22 }
 0x133   :  { %v192_v29 = vpop.f32.mrf.mxu2  ;;  %v212_v31 = vpop.f32.mrf.mxu3 }
 0x134   :  { %v193_v30 = vadd.f32 %v192_v29, %v174_v28 }
 0x136   :  { %v213_v32 = vadd.f32 %v212_v31, %v193_v30 }
 0x138   :  { %v215_v33 = vmul.f32 0.2, %v213_v32 }
 0x13a   :  { %v216_v34 = vmax.f32 %v213_v32, %v215_v33 }
 0x13c   :  { %250 = vmatmul.f32.vlgmr.msrb.gmra.mxu0 %v216_v34 }
 0x1b9   :  { %v251_v36 = vpop.f32.mrf.mxu0 }
 0x1ba   :  { %v252_v37 = vadd.f32 %v251_v36, %v233_v35 }
 0x1bc   :  { %v293_v38 = vmul.f32 -1.442695, %v252_v37 }
 0x1be   :  { %301 = vpow2.f32 %v293_v38 }
 0x1c4   :  { %v302_v39 = vpop.eup %301 }
 0x1c5   :  { %v257_v40 = vadd.f32 1.0, %v302_v39 }
 0x1c7   :  { %303 = vrcp.f32 %v257_v40  ;;  %v269_v44 = vand.u32 2147483648, %v257_v40  ;;  %v267_v46 = vand.u32 2147483647, %v257_v40  ;;  %vm263_vm1 = vweird.f32 %v257_v40 }
 0x1c9   :  { %v270_v48 = vor.u32 1.1754944e-38, %v269_v44  ;;  %vm268_vm4 = vcmp.eq.f32.partialorder %v267_v46, 8.507059e+37 }
 0x1cd   :  { %v304_v41 = vpop.eup %303 }
 0x1ce   :  { %v259_v42 = vmul.f32 %v304_v41, %v257_v40  ;;  %vm264_vm0 = vweird.f32 %v304_v41 }
 0x1cf   :  { %vm265_vm2 = vmor %vm263_vm1, %vm264_vm0 }
 0x1d0   :  { %v260_v43 = vsub.f32 1.0, %v259_v42 }
 0x1d2   :  { %v261_v45 = vmul.f32 %v304_v41, %v260_v43 }
 0x1d4   :  { %v262_v47 = vadd.f32 %v304_v41, %v261_v45 }
 0x1d6   :  { %v266_v49 = vsel %vm265_vm2, %v304_v41, %v262_v47 }
 0x1d7   :  { %v271_v50 = vsel %vm268_vm4, %v270_v48, %v266_v49 }
 0x1d8   :  { %274 = vst.msk [vmem:[#allocation7] sm:$0x1] %vm273_vm3, %v271_v50 }
 0x1d9   :  { %285 = dma.vmem_to_hbm [thread:$0]  %s281_s5, 16, %s283_s6, [#allocation4]  }
 0x1da   :  { %381 = dma.done.wait [#allocation4], 16  }
 0x1db   :  { %382 = vsyncadd [#allocation4], 4294967280 }
 0x1dc   :  { %290 = vsyncpa [#allocation3], 1 }
 0x1dd   :  { %291 = vsyncpa [#allocation6], 1 }
 0x1de   :  { %292 = vsyncpa [#allocation4], 1 }

</bundles_post_ra>
